<compile_context>
chip_gen: v7x
topology: tpu7x:2x2x1
jax: 0.10.0
libtpu: 0.0.40
codegen_flags: <defaults>
</compile_context>

<pallas_src>
import functools

import jax
import jax.numpy as jnp
from jax.experimental import pallas as pl
from jax.experimental.pallas import tpu as pltpu

CLAS = 100       # `clas` in the reference module
_TN_MAX = 1024   # batch-tile rows: f32 logits = 400 B/row -> ~0.4 MiB per
                 # input buffer, ~1.6 MiB double-buffered -> safely under the
                 # scoped VMEM limits of v5e (16 MiB), v6e (32 MiB), v7x (32 MiB)
                 # while >512 rows already saturates the HBM roofline.


def _gce_kernel(out_ref, tgt_ref, loss_ref, *, q):
    # out_ref:  (TN, C) logits, native dtype (bf16/f32) -- cast to f32 on VPU
    # tgt_ref:  (TN, 1) int32 labels
    # loss_ref: (TN, 1) per-example GCE loss (xt='gd' path)
    logits = out_ref[...].astype(jnp.float32)

    # numerically-stable softmax pieces along classes (dim=1).  The full
    # (TN, C) softmax is never materialized: only the true-class numerator
    # and the row denominator are needed (saves a full-tile VPU multiply).
    m = jnp.max(logits, axis=1, keepdims=True)
    e = jnp.exp(logits - m)
    denom = jnp.sum(e, axis=1, keepdims=True)                      # (TN, 1)

    # exp(logit) of the true class via a one-hot select + row sum
    tgt = tgt_ref[...]                                             # (TN, 1)
    col = jax.lax.broadcasted_iota(jnp.int32, logits.shape, dimension=1)
    num = jnp.sum(jnp.where(col == tgt, e, 0.0), axis=1, keepdims=True)

    # pred_y = softmax(logits)[y]; approx reciprocal only touches the (TN,1)
    # vector and runs on the otherwise-idle EUP slot.
    pred_y = num * pl.reciprocal(denom, approx=True)

    # torch.clamp(pred_y, 0.0001)  (min-clamp only)
    pred_y = jnp.maximum(pred_y, jnp.float32(0.0001))

    # (1 - pred_y**q) / q
    loss_ref[...] = (1.0 - jnp.power(pred_y, jnp.float32(q))) / jnp.float32(q)


def _round_up(x, m):
    return (x + m - 1) // m * m


def gce_loss(outputs, targets, q=0.8, xt='gd', tile_rows=None):
    """Pallas implementation of GCE_loss.forward.

    outputs: (N, CLAS) float logits (f32 or bf16; passed in native dtype,
             cast to f32 inside the kernel)
    targets: (N,) integer class labels
    returns: (N,) per-example loss if xt='gd', scalar mean if xt='mean'
    """
    n, c = outputs.shape
    assert c == CLAS
    tgt2d = targets.astype(jnp.int32).reshape(n, 1)

    # Batch tile.  Trailing partial blocks are fine: all reductions are along
    # the class axis (within a row), and Pallas masks out-of-bounds stores.
    tn = tile_rows if tile_rows is not None else min(_TN_MAX, _round_up(n, 8))
    grid = (pl.cdiv(n, tn),)

    per_example = pl.pallas_call(
        functools.partial(_gce_kernel, q=q),
        out_shape=jax.ShapeDtypeStruct((n, 1), jnp.float32),
        grid=grid,
        in_specs=[
            pl.BlockSpec((tn, CLAS), lambda i: (i, 0)),  # class dim kept at 100 (== full dim)
            pl.BlockSpec((tn, 1), lambda i: (i, 0)),
        ],
        out_specs=pl.BlockSpec((tn, 1), lambda i: (i, 0)),
        compiler_params=pltpu.CompilerParams(
            dimension_semantics=("parallel",)),  # shards row-tiles across v7x's 2 TCs
    )(outputs, tgt2d)

    per_example = per_example.reshape(n)
    if xt == 'mean':
        # glue reduction outside the kernel (trivial mean over batch)
        return jnp.mean(per_example, axis=0)
    return per_example


def _gce_ref(outputs, targets, q=0.8):
    # pure-JAX reference for sanity checking
    pred = jax.nn.softmax(outputs.astype(jnp.float32), axis=1)
    onehot = jax.nn.one_hot(targets, CLAS, dtype=jnp.float32)
    pred_y = jnp.sum(onehot * pred, axis=1)
    pred_y = jnp.maximum(pred_y, 0.0001)
    return (1.0 - pred_y ** q) / q


if __name__ == "__main__":
    key = jax.random.PRNGKey(0)
    k1, k2 = jax.random.split(key)

    N = 16
    outputs = jax.random.normal(k1, (N, CLAS), dtype=jnp.float32)
    targets = jax.random.randint(k2, (N,), 0, CLAS, dtype=jnp.int32)
    ref = _gce_ref(outputs, targets, q=0.8)

    # 'gd' path, forced multi-block grid (2 tiles of 8 rows) to exercise the
    # pipelined path at a small shape.
    loss = gce_loss(outputs, targets, q=0.8, xt='gd', tile_rows=8)
    loss = jax.block_until_ready(loss)
    assert loss.shape == (N,)
    # approx reciprocal -> verify at 1e-4 (well below any practical tolerance)
    assert jnp.allclose(loss, ref, atol=1e-4, rtol=1e-4), (loss, ref)

    # 'mean' path, default (single-block) tiling
    mean_loss = gce_loss(outputs, targets, q=0.8, xt='mean')
    mean_loss = jax.block_until_ready(mean_loss)
    assert jnp.allclose(mean_loss, jnp.mean(ref), atol=1e-4, rtol=1e-4), (
        mean_loss, jnp.mean(ref))

    print("KERNEL_OK")
</pallas_src>

<mosaic_0001>
module attributes {stable_mosaic.version = 11 : i64} {
  func.func @_gce_kernel(%arg0: i32, %arg1: memref<8x100xf32, #tpu.memory_space<vmem>>, %arg2: memref<8x1xi32, #tpu.memory_space<vmem>>, %arg3: memref<8x1xf32, #tpu.memory_space<vmem>>) attributes {dimension_semantics = [#tpu.dimension_semantics<parallel>], iteration_bounds = array<i64: 2>, scalar_prefetch = 0 : i64, scratch_operands = 0 : i64, tpu.core_type = #tpu.core_type<tc>, window_params = [{transform_indices = @transform_0, window_bounds = array<i64: 8, 100>}, {transform_indices = @transform_1, window_bounds = array<i64: 8, 1>}, {transform_indices = @transform_2, window_bounds = array<i64: 8, 1>}]} {
    %c0 = arith.constant 0 : index
    %c0_0 = arith.constant 0 : index
    %0 = vector.load %arg1[%c0, %c0_0] : memref<8x100xf32, #tpu.memory_space<vmem>>, vector<8x100xf32>
    %cst = arith.constant dense<0xFF800000> : vector<8xf32>
    %1 = vector.multi_reduction <maximumf>, %0, %cst [1] : vector<8x100xf32> to vector<8xf32>
    %2 = vector.shape_cast %1 : vector<8xf32> to vector<8x1xf32>
    %3 = vector.broadcast %2 : vector<8x1xf32> to vector<8x100xf32>
    %4 = arith.subf %0, %3 : vector<8x100xf32>
    %5 = math.exp %4 : vector<8x100xf32>
    %cst_1 = arith.constant dense<0.000000e+00> : vector<8xf32>
    %6 = vector.multi_reduction <add>, %5, %cst_1 [1] : vector<8x100xf32> to vector<8xf32>
    %7 = vector.shape_cast %6 : vector<8xf32> to vector<8x1xf32>
    %c0_2 = arith.constant 0 : index
    %c0_3 = arith.constant 0 : index
    %8 = vector.load %arg2[%c0_2, %c0_3] : memref<8x1xi32, #tpu.memory_space<vmem>>, vector<8x1xi32>
    %9 = tpu.iota {dimensions = array<i32: 1>} : vector<8x100xi32>
    %10 = vector.broadcast %8 : vector<8x1xi32> to vector<8x100xi32>
    %11 = arith.cmpi eq, %9, %10 : vector<8x100xi32>
    %cst_4 = arith.constant 0.000000e+00 : f32
    %12 = vector.broadcast %cst_4 : f32 to vector<8x100xf32>
    %13 = arith.select %11, %5, %12 : vector<8x100xi1>, vector<8x100xf32>
    %cst_5 = arith.constant dense<0.000000e+00> : vector<8xf32>
    %14 = vector.multi_reduction <add>, %13, %cst_5 [1] : vector<8x100xf32> to vector<8xf32>
    %15 = vector.shape_cast %14 : vector<8xf32> to vector<8x1xf32>
    %16 = tpu.reciprocal %7 {approx = true} : vector<8x1xf32> -> vector<8x1xf32>
    %17 = arith.mulf %15, %16 : vector<8x1xf32>
    %cst_6 = arith.constant 9.99999974E-5 : f32
    %18 = vector.broadcast %cst_6 : f32 to vector<8x1xf32>
    %19 = arith.maximumf %17, %18 : vector<8x1xf32>
    %cst_7 = arith.constant 8.000000e-01 : f32
    %20 = vector.broadcast %cst_7 : f32 to vector<8x1xf32>
    %21 = math.powf %19, %20 : vector<8x1xf32>
    %cst_8 = arith.constant 1.000000e+00 : f32
    %22 = vector.broadcast %cst_8 : f32 to vector<8x1xf32>
    %23 = arith.subf %22, %21 : vector<8x1xf32>
    %cst_9 = arith.constant 8.000000e-01 : f32
    %24 = vector.broadcast %cst_9 : f32 to vector<8x1xf32>
    %25 = arith.divf %23, %24 : vector<8x1xf32>
    %c0_10 = arith.constant 0 : index
    %c0_11 = arith.constant 0 : index
    %26 = vector.load %arg3[%c0_10, %c0_11] : memref<8x1xf32, #tpu.memory_space<vmem>>, vector<8x1xf32>
    tpu.vector_store %arg3[%c0_10, %c0_11], %25 {strides = array<i32>} : memref<8x1xf32, #tpu.memory_space<vmem>>, vector<8x1xf32>,
    return
  }
  func.func @transform_0(%arg0: i32) -> (i32, i32) {
    %c0_i32 = arith.constant 0 : i32
    %c0_i32_0 = arith.constant 0 : i32
    return %arg0, %c0_i32 : i32, i32
  }
  func.func @transform_1(%arg0: i32) -> (i32, i32) {
    %c0_i32 = arith.constant 0 : i32
    %c0_i32_0 = arith.constant 0 : i32
    return %arg0, %c0_i32 : i32, i32
  }
  func.func @transform_2(%arg0: i32) -> (i32, i32) {
    %c0_i32 = arith.constant 0 : i32
    %c0_i32_0 = arith.constant 0 : i32
    return %arg0, %c0_i32 : i32, i32
  }
}

</mosaic_0001>

<bundles_post_ra>
// kernel: tpu_custom_call.1
= control target key start
LH: loop header
LB: loop body
LE: loop exit
PB: predicated region body
PF: predicated region fallthrough
CT: control target
= control target key end

     0   :  { %s330_s9 = smov 0   ;;  %s358_s0 = inlined_call_operand.vmem [shape: f32[16,100], index: 0, kind: input, shape index: {}]   ;;  %s359_s1 = inlined_call_operand.vmem [shape: s32[16,1], index: 1, kind: input, shape index: {}]   ;;  %s360_s2 = inlined_call_operand.vmem [shape: f32[16,1], index: 2, kind: output, shape index: {}]  }
   0x1 LB: > { %s252_s10 = sadd.s32 4294967295, %s312_s9   ;;  %p256_p0 = scmp.ge.s32.totalorder %s312_s9, 1  ;;  %s312_s9 = sphi %s330_s9, %s12_s9  }
   0x2   : > { %p120_p1 = scmp.lt.s32.totalorder %s312_s9, 3 }
   0x4   : > { %p121_p2 = pnand %p256_p0, %p120_p1 }
   0x5   : > { %p144_p3 = scmp.lt.s32.totalorder (!%p121_p2), %s252_s10, 1  ;;  %v314_v0 = vmov (!%p121_p2), 0   ;;  %vm157_vm0 = vcmask (!%p121_p2), 818176   ;;  %v168_v7 = vlaneseq (!%p121_p2)  ;;  %vm185_vm7 = vcmask (!%p121_p2), 7168  }
   0x6   : > { %124 = sbr.rel (%p121_p2) target bundleno = 369 (0x171), region = 28  ;;  %297 = vset.pattern.permute.xlu0 (!%p121_p2), %v314_v0 }
   0x7   : > { %v169_v8 = vand.u32 (!%p121_p2), 127, %v168_v7 }
   0xd   : > { %s362_s10 = smov (!%p144_p3, %s252_s10), 1 }
   0xe   : > { %s338_s11 = sshll.u32 %s362_s10, 3 }
   0xf   : > { %s147_s14 = scalar_lea.vmem %s358_s0, %s338_s11  ;;  %s151_s17 = scalar_lea.vmem %s359_s1, %s338_s11 }
  0x10   : > { %v156_v1 = vld [vmem:[%s147_s14] sm:$0xff]  ;;  %s155_s20 = scalar_lea.vmem %s360_s2, %s338_s11 }
  0x11   : > { %v158_v2 = vsel %vm157_vm0, %v156_v1, -inf  ;;  %v167_v3 = vld [vmem:[%s151_s17] sm:$0xff] }
  0x12   : > { %159 = vmax.xlane.f32.xlu0 %v158_v2 }
  0x28   : > { %171 = vperm.xlu0 %297, %v167_v3  }
  0x9f   : > { %v160_v4 = vpop.xlane.xlu0 %159 }
  0xa0   : > { %v161_v5 = vsub.f32 %v156_v1, %v160_v4 }
  0xa2   : > { %v162_v6 = vmul.f32 1.442695, %v161_v5 }
  0xa4   : > { %298 = vpow2.f32 %v162_v6 }
  0xa7   : > { %v172_v9 = vpop.permute.xlu0 %171 }
  0xa8   : > { %vm173_vm1 = vcmp.eq.s32.totalorder %v169_v8, %v172_v9 }
  0xae   : > { %v299_v10 = vpop.eup %298 }
  0xaf   : > { %v164_v11 = vsel %vm157_vm0, %v299_v10, 0.0  ;;  %v174_v12 = vsel %vm173_vm1, %v299_v10, 0.0 }
  0xb0   : > { %165 = vadd.xlane.f32.xlu1 %v164_v11  ;;  %v175_v13 = vsel %vm157_vm0, %v174_v12, 0.0 }
  0xb4   : > { %176 = vadd.xlane.f32.xlu1 %v175_v13 }
 0x13d   : > { %v166_v14 = vpop.xlane.xlu1 %165 }
 0x13e   : > { %300 = vrcp.f32 %v166_v14 }
 0x141   : > { %v177_v16 = vpop.xlane.xlu1 %176 }
 0x148   : > { %v301_v15 = vpop.eup %300 }
 0x149   : > { %v179_v17 = vmul.f32 %v301_v15, %v177_v16 }
 0x14b   : > { %v180_v18 = vmax.f32 %v179_v17, 0.0001 }
 0x14d   : > { %v266_v19 = vand.u32 2147483647, %v180_v18  ;;  %vm270_vm2 = vcmp.lt.f32.partialorder %v180_v18, 0  ;;  %vm271_vm3 = vcmp.eq.f32.partialorder %v180_v18, 0  ;;  %vm283_vm5 = vcmp.ne.f32.partialorder %v180_v18, %v180_v18 }
 0x14e   : > { %vm272_vm6 = vcmp.eq.f32.partialorder %v180_v18, 1065353216 }
 0x14f   : > { %302 = vlog2.f32 %v266_v19  ;;  %vm275_vm4 = vcmp.eq.f32.partialorder %v266_v19, 2139095040 }
 0x159   : > { %v303_v20 = vpop.eup %302 }
 0x15a   : > { %v268_v21 = vmul.f32 0.8, %v303_v20 }
 0x15c   : > { %304 = vpow2.f32 %v268_v21 }
 0x166   : > { %v305_v22 = vpop.eup %304 }
 0x167   : > { %v276_v23 = vsel %vm270_vm2, 2143289344, %v305_v22 }
 0x168   : > { %v277_v24 = vsel %vm271_vm3, 0, %v276_v23 }
 0x169   : > { %v282_v25 = vsel %vm275_vm4, 2139095040, %v277_v24 }
 0x16a   : > { %v286_v26 = vsel %vm283_vm5, 2143289344, %v282_v25 }
 0x16b   : > { %v287_v27 = vsel %vm272_vm6, 1065353216, %v286_v26 }
 0x16c   : > { %v182_v28 = vsub.f32 1.0, %v287_v27 }
 0x16e   : > { %v184_v29 = vmul.f32 1.25, %v182_v28 }
 0x170   : > { %186 = vst.msk [vmem:[%s155_s20] sm:$0xff] %vm185_vm7, %v184_v29 }
 0x171 PF: > { %s12_s9 = sadd.s32 1, %s312_s9  }
 0x172   : > { %p9_p4 = scmp.ge.s32.totalorder %s12_s9, 4  }
 0x174   :  { %11 = sbr.rel (!%p9_p4) target bundleno = 1 (0x1), region = 61 }

</bundles_post_ra>
